<compile_context>
chip_gen: v5e
topology: v5e:2x2
jax: 0.10.0
libtpu: 0.0.40
codegen_flags: <defaults>
</compile_context>

<pallas_src>
import jax
import jax.numpy as jnp
from jax.experimental import pallas as pl
from jax.experimental.pallas import tpu as pltpu

NEG_SLOPE = 0.01   # F.leaky_relu default
BN_EPS = 1e-5      # BatchNorm default eps
LANE = 128         # lane-dense padding target


def _leaky_relu(x):
    return jnp.where(x > 0, x, NEG_SLOPE * x)


# ---------------------------------------------------------------------------
# Fused kernel: 4x (ChebConv K=2 + folded BN [+ LeakyReLU]) + mean-pool matmul
#               + LeakyReLU + 4-layer MLP head + sigmoid.
# All operands are whole-array VMEM residents; no grid.
# ---------------------------------------------------------------------------
def _fused_forward_kernel(x_ref, l_ref, p_ref,
                          w0a_ref, w1a_ref, sa_ref,     # layer 1 (Fin=4, Fout padded to 128)
                          wb_ref, sb_ref,               # layer 2 (stacked [2*128, 128])
                          wc_ref, sc_ref,               # layer 3 (stacked [2*128, 128])
                          wd_ref, sd_ref,               # layer 4 (stacked [2*128, 256])
                          fw1_ref, fb1_ref, fw2_ref, fb2_ref,
                          fw3_ref, fb3_ref, fw4_ref, fb4_ref,
                          o_ref):
    f32 = jnp.float32
    l = l_ref[...]                                     # [M, M] block-diag scaled Laplacian
    h = x_ref[...]                                     # [M, F0]

    # --- layer 1 (Fin=4): two small matmuls; BN + bias folded into W/shift ---
    lx = jnp.dot(l, h, preferred_element_type=f32)
    h = (jnp.dot(h, w0a_ref[...], preferred_element_type=f32)
         + jnp.dot(lx, w1a_ref[...], preferred_element_type=f32)
         + sa_ref[...])
    h = _leaky_relu(h)                                 # [M, 128] (cols 30.. are exactly 0)

    # --- layers 2-4 (Fin=128): single K=256 matmul on [X | L_hat@X] ---
    def cheb_bn(h, w_ref, s_ref, apply_lrelu):
        lx = jnp.dot(l, h, preferred_element_type=f32)
        hc = jnp.concatenate([h, lx], axis=-1)         # [M, 256], lane-aligned concat
        z = jnp.dot(hc, w_ref[...], preferred_element_type=f32) + s_ref[...]
        return _leaky_relu(z) if apply_lrelu else z

    h = cheb_bn(h, wb_ref, sb_ref, True)
    h = cheb_bn(h, wc_ref, sc_ref, True)
    h = cheb_bn(h, wd_ref, sd_ref, False)              # LeakyReLU applied AFTER pooling

    # --- global_mean_pool as MXU matmul with block-diagonal 1/N pooling matrix ---
    pooled = jnp.dot(p_ref[...], h, preferred_element_type=f32)   # [B, 256]
    g = _leaky_relu(pooled)

    # --- MLP head (dropout = identity at inference) ---
    g = jnp.maximum(jnp.dot(g, fw1_ref[...], preferred_element_type=f32) + fb1_ref[...], 0.0)
    g = jnp.maximum(jnp.dot(g, fw2_ref[...], preferred_element_type=f32) + fb2_ref[...], 0.0)
    g = jnp.maximum(jnp.dot(g, fw3_ref[...], preferred_element_type=f32) + fb3_ref[...], 0.0)
    logit = jnp.dot(g, fw4_ref[...], preferred_element_type=f32) + fb4_ref[...]
    o_ref[...] = 1.0 / (1.0 + jnp.exp(-logit))


# ---------------------------------------------------------------------------
# Host-side parameter preparation (done ONCE, outside the jitted forward):
# fold eval-mode BN + bias into weights, zero-pad layer-1 Fout (30 -> 128) /
# layer-2 Fin rows, and K-stack W0/W1 for the Fin=128 layers.
# ---------------------------------------------------------------------------
def _fold_bn(w0, w1, bias, gamma, beta):
    # eval BatchNorm with running_mean=0, running_var=1:
    #   bn(h) = h * gamma/sqrt(1+eps) + beta
    scale = gamma / jnp.sqrt(1.0 + BN_EPS)             # [1, Fout]
    return w0 * scale, w1 * scale, bias * scale + beta


def _pad_cols(a, to):
    return jnp.pad(a, ((0, 0), (0, to - a.shape[1])))


def _pad_rows(a, to):
    return jnp.pad(a, ((0, to - a.shape[0]), (0, 0)))


def prepare_cheb_params(cheb_raw):
    # layer 1: fold BN, pad Fout 30 -> 128 with zeros (shift padded with 0 so lanes stay 0)
    w0, w1, sh = _fold_bn(*cheb_raw[0])
    layer1 = (_pad_cols(w0, LANE), _pad_cols(w1, LANE), _pad_cols(sh, LANE))

    stacked = []
    for li in (1, 2, 3):
        w0, w1, sh = _fold_bn(*cheb_raw[li])
        if li == 1:  # layer 2 consumes the padded layer-1 output: zero-pad its input rows
            w0 = _pad_rows(w0, LANE)
            w1 = _pad_rows(w1, LANE)
        stacked.append((jnp.concatenate([w0, w1], axis=0), sh))   # [2*Fin, Fout]
    return layer1, stacked


def prepare_kernel_args(x, l_hat, cheb_raw, fc_params):
    """One-time host prep: node-major input, pooling matrix, folded/padded params."""
    B, _, N, F0 = x.shape
    M = B * N
    # torch.squeeze(x, dim=1) then Batch.from_data_list node stacking -> node-major [B*N, F0]
    h0 = jnp.squeeze(x, axis=1).reshape(M, F0).astype(jnp.float32)
    # global_mean_pool as a [B, M] block-diagonal matrix with 1/N entries
    pool = jnp.repeat(jnp.eye(B, dtype=jnp.float32), N, axis=1) / float(N)

    (w0a, w1a, sa), stacked = prepare_cheb_params(cheb_raw)
    (wb, sb), (wc, sc), (wd, sd) = stacked
    (fw1, fb1), (fw2, fb2), (fw3, fb3), (fw4, fb4) = fc_params

    return (h0, l_hat.astype(jnp.float32), pool,
            w0a, w1a, sa, wb, sb, wc, sc, wd, sd,
            fw1, fb1, fw2, fb2, fw3, fb3, fw4, fb4)


# ---------------------------------------------------------------------------
# Dense block-diagonal scaled Laplacian  L_hat = -D^{-1/2} A D^{-1/2}
# (PyG ChebConv with sym normalization and default lambda_max = 2.0)
# ---------------------------------------------------------------------------
def build_block_laplacian(adj):
    deg = adj.sum(axis=-1)                                        # [B, N]
    dis = jnp.where(deg > 0, 1.0 / jnp.sqrt(deg), 0.0)
    l_blocks = -(dis[:, :, None] * adj * dis[:, None, :])         # [B, N, N]
    B, N, _ = adj.shape
    M = B * N
    l_hat = jnp.zeros((M, M), jnp.float32)
    for g in range(B):
        l_hat = l_hat.at[g * N:(g + 1) * N, g * N:(g + 1) * N].set(l_blocks[g])
    return l_hat


def eeg_cheb_net_forward(*args):
    """Steady-state forward: a single fused pallas_call on pre-prepared args."""
    B = args[2].shape[0]   # pool matrix is [B, M]
    vspec = pl.BlockSpec(memory_space=pltpu.MemorySpace.VMEM)     # whole-array VMEM resident
    return pl.pallas_call(
        _fused_forward_kernel,
        out_shape=jax.ShapeDtypeStruct((B, 1), jnp.float32),
        in_specs=[vspec] * len(args),
        out_specs=vspec,
    )(*args)


# ---------------------------------------------------------------------------
# Pure-JAX reference (unfolded, unpadded) for correctness validation.
# ---------------------------------------------------------------------------
def reference_forward(x, l_hat, cheb_raw, fc_params):
    B, _, N, F0 = x.shape
    h = jnp.squeeze(x, axis=1).reshape(B * N, F0)
    for li, (w0, w1, bias, gamma, beta) in enumerate(cheb_raw):
        lx = l_hat @ h
        z = h @ w0 + lx @ w1 + bias
        z = z * (gamma / jnp.sqrt(1.0 + BN_EPS)) + beta
        if li < 3:
            z = _leaky_relu(z)
        h = z
    pooled = h.reshape(B, N, -1).mean(axis=1)
    g = _leaky_relu(pooled)
    for i, (w, b) in enumerate(fc_params):
        g = g @ w + b
        if i < 3:
            g = jnp.maximum(g, 0.0)
    return jax.nn.sigmoid(g)


if __name__ == "__main__":
    key = jax.random.PRNGKey(0)
    B, N, F0 = 2, 16, 4                      # 2 graphs, 16 EEG electrodes, 4 feats/node
    dims = [F0, 30, 128, 128, 256]           # cheb1..cheb4 output dims

    k_x, k_a, k_p = jax.random.split(key, 3)

    # model input: [B, 1, N, F]
    x = jax.random.normal(k_x, (B, 1, N, F0), jnp.float32)

    # synthetic per-graph weighted adjacency -> dense scaled Laplacian
    a = jax.random.uniform(k_a, (B, N, N), jnp.float32)
    a = 0.5 * (a + jnp.swapaxes(a, 1, 2))
    a = a * (1.0 - jnp.eye(N, dtype=jnp.float32)[None])
    l_hat = build_block_laplacian(a)

    # raw synthetic parameters: ChebConv K=2 (W0, W1, bias) + BatchNorm (gamma, beta)
    cheb_raw = []
    pk = k_p
    for li in range(4):
        fin, fout = dims[li], dims[li + 1]
        pk, k0, k1, kb, kg, kbe = jax.random.split(pk, 6)
        w0 = jax.random.normal(k0, (fin, fout), jnp.float32) / jnp.sqrt(float(fin))
        w1 = jax.random.normal(k1, (fin, fout), jnp.float32) / jnp.sqrt(float(fin))
        bias = 0.01 * jax.random.normal(kb, (1, fout), jnp.float32)
        gamma = 1.0 + 0.1 * jax.random.normal(kg, (1, fout), jnp.float32)
        beta = 0.1 * jax.random.normal(kbe, (1, fout), jnp.float32)
        cheb_raw.append((w0, w1, bias, gamma, beta))

    fc_params = []
    for fin, fout in [(256, 128), (128, 64), (64, 32), (32, 1)]:
        pk, kw, kb = jax.random.split(pk, 3)
        w = jax.random.normal(kw, (fin, fout), jnp.float32) / jnp.sqrt(float(fin))
        b = 0.01 * jax.random.normal(kb, (1, fout), jnp.float32)
        fc_params.append((w, b))

    # One-time host prep (fold BN/bias, pad, stack, build pooling matrix),
    # then a jitted forward that is purely the fused pallas_call.
    args = jax.block_until_ready(prepare_kernel_args(x, l_hat, cheb_raw, fc_params))
    fwd = jax.jit(eeg_cheb_net_forward)

    out = jax.block_until_ready(fwd(*args))

    ref = reference_forward(x, l_hat, cheb_raw, fc_params)
    assert out.shape == (B, 1)
    assert bool(jnp.all((out >= 0.0) & (out <= 1.0)))
    assert bool(jnp.allclose(out, ref, atol=5e-3, rtol=5e-3)), (out, ref)
    print("KERNEL_OK")
</pallas_src>

<mosaic_0001>
module attributes {stable_mosaic.version = 11 : i64} {
  func.func @_fused_forward_kernel(%arg0: memref<32x4xf32, #tpu.memory_space<vmem>>, %arg1: memref<32x32xf32, #tpu.memory_space<vmem>>, %arg2: memref<2x32xf32, #tpu.memory_space<vmem>>, %arg3: memref<4x128xf32, #tpu.memory_space<vmem>>, %arg4: memref<4x128xf32, #tpu.memory_space<vmem>>, %arg5: memref<1x128xf32, #tpu.memory_space<vmem>>, %arg6: memref<256x128xf32, #tpu.memory_space<vmem>>, %arg7: memref<1x128xf32, #tpu.memory_space<vmem>>, %arg8: memref<256x128xf32, #tpu.memory_space<vmem>>, %arg9: memref<1x128xf32, #tpu.memory_space<vmem>>, %arg10: memref<256x256xf32, #tpu.memory_space<vmem>>, %arg11: memref<1x256xf32, #tpu.memory_space<vmem>>, %arg12: memref<256x128xf32, #tpu.memory_space<vmem>>, %arg13: memref<1x128xf32, #tpu.memory_space<vmem>>, %arg14: memref<128x64xf32, #tpu.memory_space<vmem>>, %arg15: memref<1x64xf32, #tpu.memory_space<vmem>>, %arg16: memref<64x32xf32, #tpu.memory_space<vmem>>, %arg17: memref<1x32xf32, #tpu.memory_space<vmem>>, %arg18: memref<32x1xf32, #tpu.memory_space<vmem>>, %arg19: memref<1x1xf32, #tpu.memory_space<vmem>>, %arg20: memref<2x1xf32, #tpu.memory_space<vmem>>) attributes {dimension_semantics = [], scalar_prefetch = 0 : i64, scratch_operands = 0 : i64, tpu.core_type = #tpu.core_type<tc>} {
    %c0 = arith.constant 0 : index
    %c0_0 = arith.constant 0 : index
    %0 = vector.load %arg1[%c0, %c0_0] : memref<32x32xf32, #tpu.memory_space<vmem>>, vector<32x32xf32>
    %c0_1 = arith.constant 0 : index
    %c0_2 = arith.constant 0 : index
    %1 = vector.load %arg0[%c0_1, %c0_2] : memref<32x4xf32, #tpu.memory_space<vmem>>, vector<32x4xf32>
    %cst = arith.constant dense<0.000000e+00> : vector<32x4xf32>
    %2 = tpu.matmul %0, %1, %cst {dimension_numbers = #tpu.dot_dimension_numbers<[1], [0], [0], [1], [0, 0, 1, 1], [], []>} : vector<32x32xf32>, vector<32x4xf32>, vector<32x4xf32> -> vector<32x4xf32>
    %c0_3 = arith.constant 0 : index
    %c0_4 = arith.constant 0 : index
    %3 = vector.load %arg3[%c0_3, %c0_4] : memref<4x128xf32, #tpu.memory_space<vmem>>, vector<4x128xf32>
    %cst_5 = arith.constant dense<0.000000e+00> : vector<32x128xf32>
    %4 = tpu.matmul %1, %3, %cst_5 {dimension_numbers = #tpu.dot_dimension_numbers<[1], [0], [0], [1], [0, 0, 1, 1], [], []>} : vector<32x4xf32>, vector<4x128xf32>, vector<32x128xf32> -> vector<32x128xf32>
    %c0_6 = arith.constant 0 : index
    %c0_7 = arith.constant 0 : index
    %5 = vector.load %arg4[%c0_6, %c0_7] : memref<4x128xf32, #tpu.memory_space<vmem>>, vector<4x128xf32>
    %cst_8 = arith.constant dense<0.000000e+00> : vector<32x128xf32>
    %6 = tpu.matmul %2, %5, %cst_8 {dimension_numbers = #tpu.dot_dimension_numbers<[1], [0], [0], [1], [0, 0, 1, 1], [], []>} : vector<32x4xf32>, vector<4x128xf32>, vector<32x128xf32> -> vector<32x128xf32>
    %7 = arith.addf %4, %6 : vector<32x128xf32>
    %c0_9 = arith.constant 0 : index
    %c0_10 = arith.constant 0 : index
    %8 = vector.load %arg5[%c0_9, %c0_10] : memref<1x128xf32, #tpu.memory_space<vmem>>, vector<1x128xf32>
    %9 = vector.broadcast %8 : vector<1x128xf32> to vector<32x128xf32>
    %10 = arith.addf %7, %9 : vector<32x128xf32>
    %cst_11 = arith.constant 0.000000e+00 : f32
    %11 = vector.broadcast %cst_11 : f32 to vector<32x128xf32>
    %12 = arith.cmpf ogt, %10, %11 : vector<32x128xf32>
    %cst_12 = arith.constant 0.00999999977 : f32
    %13 = vector.broadcast %cst_12 : f32 to vector<32x128xf32>
    %14 = arith.mulf %13, %10 : vector<32x128xf32>
    %15 = arith.select %12, %10, %14 : vector<32x128xi1>, vector<32x128xf32>
    %cst_13 = arith.constant dense<0.000000e+00> : vector<32x128xf32>
    %16 = tpu.matmul %0, %15, %cst_13 {dimension_numbers = #tpu.dot_dimension_numbers<[1], [0], [0], [1], [0, 0, 1, 1], [], []>} : vector<32x32xf32>, vector<32x128xf32>, vector<32x128xf32> -> vector<32x128xf32>
    %17 = tpu.concatenate %15, %16 in 1 : vector<32x128xf32>, vector<32x128xf32> -> vector<32x256xf32>
    %c0_14 = arith.constant 0 : index
    %c0_15 = arith.constant 0 : index
    %18 = vector.load %arg6[%c0_14, %c0_15] : memref<256x128xf32, #tpu.memory_space<vmem>>, vector<256x128xf32>
    %cst_16 = arith.constant dense<0.000000e+00> : vector<32x128xf32>
    %19 = tpu.matmul %17, %18, %cst_16 {dimension_numbers = #tpu.dot_dimension_numbers<[1], [0], [0], [1], [0, 0, 1, 1], [], []>} : vector<32x256xf32>, vector<256x128xf32>, vector<32x128xf32> -> vector<32x128xf32>
    %c0_17 = arith.constant 0 : index
    %c0_18 = arith.constant 0 : index
    %20 = vector.load %arg7[%c0_17, %c0_18] : memref<1x128xf32, #tpu.memory_space<vmem>>, vector<1x128xf32>
    %21 = vector.broadcast %20 : vector<1x128xf32> to vector<32x128xf32>
    %22 = arith.addf %19, %21 : vector<32x128xf32>
    %cst_19 = arith.constant 0.000000e+00 : f32
    %23 = vector.broadcast %cst_19 : f32 to vector<32x128xf32>
    %24 = arith.cmpf ogt, %22, %23 : vector<32x128xf32>
    %cst_20 = arith.constant 0.00999999977 : f32
    %25 = vector.broadcast %cst_20 : f32 to vector<32x128xf32>
    %26 = arith.mulf %25, %22 : vector<32x128xf32>
    %27 = arith.select %24, %22, %26 : vector<32x128xi1>, vector<32x128xf32>
    %cst_21 = arith.constant dense<0.000000e+00> : vector<32x128xf32>
    %28 = tpu.matmul %0, %27, %cst_21 {dimension_numbers = #tpu.dot_dimension_numbers<[1], [0], [0], [1], [0, 0, 1, 1], [], []>} : vector<32x32xf32>, vector<32x128xf32>, vector<32x128xf32> -> vector<32x128xf32>
    %29 = tpu.concatenate %27, %28 in 1 : vector<32x128xf32>, vector<32x128xf32> -> vector<32x256xf32>
    %c0_22 = arith.constant 0 : index
    %c0_23 = arith.constant 0 : index
    %30 = vector.load %arg8[%c0_22, %c0_23] : memref<256x128xf32, #tpu.memory_space<vmem>>, vector<256x128xf32>
    %cst_24 = arith.constant dense<0.000000e+00> : vector<32x128xf32>
    %31 = tpu.matmul %29, %30, %cst_24 {dimension_numbers = #tpu.dot_dimension_numbers<[1], [0], [0], [1], [0, 0, 1, 1], [], []>} : vector<32x256xf32>, vector<256x128xf32>, vector<32x128xf32> -> vector<32x128xf32>
    %c0_25 = arith.constant 0 : index
    %c0_26 = arith.constant 0 : index
    %32 = vector.load %arg9[%c0_25, %c0_26] : memref<1x128xf32, #tpu.memory_space<vmem>>, vector<1x128xf32>
    %33 = vector.broadcast %32 : vector<1x128xf32> to vector<32x128xf32>
    %34 = arith.addf %31, %33 : vector<32x128xf32>
    %cst_27 = arith.constant 0.000000e+00 : f32
    %35 = vector.broadcast %cst_27 : f32 to vector<32x128xf32>
    %36 = arith.cmpf ogt, %34, %35 : vector<32x128xf32>
    %cst_28 = arith.constant 0.00999999977 : f32
    %37 = vector.broadcast %cst_28 : f32 to vector<32x128xf32>
    %38 = arith.mulf %37, %34 : vector<32x128xf32>
    %39 = arith.select %36, %34, %38 : vector<32x128xi1>, vector<32x128xf32>
    %cst_29 = arith.constant dense<0.000000e+00> : vector<32x128xf32>
    %40 = tpu.matmul %0, %39, %cst_29 {dimension_numbers = #tpu.dot_dimension_numbers<[1], [0], [0], [1], [0, 0, 1, 1], [], []>} : vector<32x32xf32>, vector<32x128xf32>, vector<32x128xf32> -> vector<32x128xf32>
    %41 = tpu.concatenate %39, %40 in 1 : vector<32x128xf32>, vector<32x128xf32> -> vector<32x256xf32>
    %c0_30 = arith.constant 0 : index
    %c0_31 = arith.constant 0 : index
    %42 = vector.load %arg10[%c0_30, %c0_31] : memref<256x256xf32, #tpu.memory_space<vmem>>, vector<256x256xf32>
    %cst_32 = arith.constant dense<0.000000e+00> : vector<32x256xf32>
    %43 = tpu.matmul %41, %42, %cst_32 {dimension_numbers = #tpu.dot_dimension_numbers<[1], [0], [0], [1], [0, 0, 1, 1], [], []>} : vector<32x256xf32>, vector<256x256xf32>, vector<32x256xf32> -> vector<32x256xf32>
    %c0_33 = arith.constant 0 : index
    %c0_34 = arith.constant 0 : index
    %44 = vector.load %arg11[%c0_33, %c0_34] : memref<1x256xf32, #tpu.memory_space<vmem>>, vector<1x256xf32>
    %45 = vector.broadcast %44 : vector<1x256xf32> to vector<32x256xf32>
    %46 = arith.addf %43, %45 : vector<32x256xf32>
    %c0_35 = arith.constant 0 : index
    %c0_36 = arith.constant 0 : index
    %47 = vector.load %arg2[%c0_35, %c0_36] : memref<2x32xf32, #tpu.memory_space<vmem>>, vector<2x32xf32>
    %cst_37 = arith.constant dense<0.000000e+00> : vector<2x256xf32>
    %48 = tpu.matmul %47, %46, %cst_37 {dimension_numbers = #tpu.dot_dimension_numbers<[1], [0], [0], [1], [0, 0, 1, 1], [], []>} : vector<2x32xf32>, vector<32x256xf32>, vector<2x256xf32> -> vector<2x256xf32>
    %cst_38 = arith.constant 0.000000e+00 : f32
    %49 = vector.broadcast %cst_38 : f32 to vector<2x256xf32>
    %50 = arith.cmpf ogt, %48, %49 : vector<2x256xf32>
    %cst_39 = arith.constant 0.00999999977 : f32
    %51 = vector.broadcast %cst_39 : f32 to vector<2x256xf32>
    %52 = arith.mulf %51, %48 : vector<2x256xf32>
    %53 = arith.select %50, %48, %52 : vector<2x256xi1>, vector<2x256xf32>
    %c0_40 = arith.constant 0 : index
    %c0_41 = arith.constant 0 : index
    %54 = vector.load %arg12[%c0_40, %c0_41] : memref<256x128xf32, #tpu.memory_space<vmem>>, vector<256x128xf32>
    %cst_42 = arith.constant dense<0.000000e+00> : vector<2x128xf32>
    %55 = tpu.matmul %53, %54, %cst_42 {dimension_numbers = #tpu.dot_dimension_numbers<[1], [0], [0], [1], [0, 0, 1, 1], [], []>} : vector<2x256xf32>, vector<256x128xf32>, vector<2x128xf32> -> vector<2x128xf32>
    %c0_43 = arith.constant 0 : index
    %c0_44 = arith.constant 0 : index
    %56 = vector.load %arg13[%c0_43, %c0_44] : memref<1x128xf32, #tpu.memory_space<vmem>>, vector<1x128xf32>
    %57 = vector.broadcast %56 : vector<1x128xf32> to vector<2x128xf32>
    %58 = arith.addf %55, %57 : vector<2x128xf32>
    %cst_45 = arith.constant 0.000000e+00 : f32
    %59 = vector.broadcast %cst_45 : f32 to vector<2x128xf32>
    %60 = arith.maximumf %58, %59 : vector<2x128xf32>
    %c0_46 = arith.constant 0 : index
    %c0_47 = arith.constant 0 : index
    %61 = vector.load %arg14[%c0_46, %c0_47] : memref<128x64xf32, #tpu.memory_space<vmem>>, vector<128x64xf32>
    %cst_48 = arith.constant dense<0.000000e+00> : vector<2x64xf32>
    %62 = tpu.matmul %60, %61, %cst_48 {dimension_numbers = #tpu.dot_dimension_numbers<[1], [0], [0], [1], [0, 0, 1, 1], [], []>} : vector<2x128xf32>, vector<128x64xf32>, vector<2x64xf32> -> vector<2x64xf32>
    %c0_49 = arith.constant 0 : index
    %c0_50 = arith.constant 0 : index
    %63 = vector.load %arg15[%c0_49, %c0_50] : memref<1x64xf32, #tpu.memory_space<vmem>>, vector<1x64xf32>
    %64 = vector.broadcast %63 : vector<1x64xf32> to vector<2x64xf32>
    %65 = arith.addf %62, %64 : vector<2x64xf32>
    %cst_51 = arith.constant 0.000000e+00 : f32
    %66 = vector.broadcast %cst_51 : f32 to vector<2x64xf32>
    %67 = arith.maximumf %65, %66 : vector<2x64xf32>
    %c0_52 = arith.constant 0 : index
    %c0_53 = arith.constant 0 : index
    %68 = vector.load %arg16[%c0_52, %c0_53] : memref<64x32xf32, #tpu.memory_space<vmem>>, vector<64x32xf32>
    %cst_54 = arith.constant dense<0.000000e+00> : vector<2x32xf32>
    %69 = tpu.matmul %67, %68, %cst_54 {dimension_numbers = #tpu.dot_dimension_numbers<[1], [0], [0], [1], [0, 0, 1, 1], [], []>} : vector<2x64xf32>, vector<64x32xf32>, vector<2x32xf32> -> vector<2x32xf32>
    %c0_55 = arith.constant 0 : index
    %c0_56 = arith.constant 0 : index
    %70 = vector.load %arg17[%c0_55, %c0_56] : memref<1x32xf32, #tpu.memory_space<vmem>>, vector<1x32xf32>
    %71 = vector.broadcast %70 : vector<1x32xf32> to vector<2x32xf32>
    %72 = arith.addf %69, %71 : vector<2x32xf32>
    %cst_57 = arith.constant 0.000000e+00 : f32
    %73 = vector.broadcast %cst_57 : f32 to vector<2x32xf32>
    %74 = arith.maximumf %72, %73 : vector<2x32xf32>
    %c0_58 = arith.constant 0 : index
    %c0_59 = arith.constant 0 : index
    %75 = vector.load %arg18[%c0_58, %c0_59] : memref<32x1xf32, #tpu.memory_space<vmem>>, vector<32x1xf32>
    %cst_60 = arith.constant dense<0.000000e+00> : vector<2x1xf32>
    %76 = tpu.matmul %74, %75, %cst_60 {dimension_numbers = #tpu.dot_dimension_numbers<[1], [0], [0], [1], [0, 0, 1, 1], [], []>} : vector<2x32xf32>, vector<32x1xf32>, vector<2x1xf32> -> vector<2x1xf32>
    %c0_61 = arith.constant 0 : index
    %c0_62 = arith.constant 0 : index
    %77 = vector.load %arg19[%c0_61, %c0_62] : memref<1x1xf32, #tpu.memory_space<vmem>>, vector<1x1xf32>
    %78 = vector.broadcast %77 : vector<1x1xf32> to vector<2x1xf32>
    %79 = arith.addf %76, %78 : vector<2x1xf32>
    %cst_63 = arith.constant 0.000000e+00 : f32
    %80 = vector.broadcast %cst_63 : f32 to vector<2x1xf32>
    %81 = arith.subf %80, %79 : vector<2x1xf32>
    %82 = math.exp %81 : vector<2x1xf32>
    %cst_64 = arith.constant 1.000000e+00 : f32
    %83 = vector.broadcast %cst_64 : f32 to vector<2x1xf32>
    %84 = arith.addf %83, %82 : vector<2x1xf32>
    %cst_65 = arith.constant 1.000000e+00 : f32
    %85 = vector.broadcast %cst_65 : f32 to vector<2x1xf32>
    %86 = arith.divf %85, %84 : vector<2x1xf32>
    %c0_66 = arith.constant 0 : index
    %c0_67 = arith.constant 0 : index
    %87 = vector.load %arg20[%c0_66, %c0_67] : memref<2x1xf32, #tpu.memory_space<vmem>>, vector<2x1xf32>
    tpu.vector_store %arg20[%c0_66, %c0_67], %86 {strides = array<i32>} : memref<2x1xf32, #tpu.memory_space<vmem>>, vector<2x1xf32>,
    return
  }
}

</mosaic_0001>

<bundles_post_ra>
// kernel: eeg_cheb_net_forward.1
= control target key start
LH: loop header
LB: loop body
LE: loop exit
PB: predicated region body
PF: predicated region fallthrough
CT: control target
= control target key end

     0   :  { %s1661_s0 = inlined_call_operand.vmem [shape: f32[32,4], index: 0, kind: input, shape index: {}]   ;;  %s1662_s1 = inlined_call_operand.hbm [shape: f32[32,32], index: 1, kind: input, shape index: {}]   ;;  %s1663_s2 = inlined_call_operand.vmem [shape: f32[2,32], index: 2, kind: input, shape index: {}]   ;;  %s1664_s3 = inlined_call_operand.vmem [shape: f32[4,128], index: 3, kind: input, shape index: {}]   ;;  %s1665_s4 = inlined_call_operand.hbm [shape: f32[4,128], index: 4, kind: input, shape index: {}]   ;;  %s1666_s5 = inlined_call_operand.vmem [shape: f32[1,128], index: 5, kind: input, shape index: {}]   ;;  %s1667_s6 = inlined_call_operand.vmem [shape: f32[256,128], index: 6, kind: input, shape index: {}]   ;;  %s1668_s7 = inlined_call_operand.vmem [shape: f32[1,128], index: 7, kind: input, shape index: {}]   ;;  %s1669_s8 = inlined_call_operand.hbm [shape: f32[256,128], index: 8, kind: input, shape index: {}]   ;;  %s1670_s9 = inlined_call_operand.vmem [shape: f32[1,128], index: 9, kind: input, shape index: {}]   ;;  %s1671_s10 = inlined_call_operand.hbm [shape: f32[256,256], index: 10, kind: input, shape index: {}]   ;;  %s1672_s11 = inlined_call_operand.vmem [shape: f32[1,256], index: 11, kind: input, shape index: {}]   ;;  %s1673_s12 = inlined_call_operand.hbm [shape: f32[256,128], index: 12, kind: input, shape index: {}]   ;;  %s1674_s13 = inlined_call_operand.vmem [shape: f32[1,128], index: 13, kind: input, shape index: {}]   ;;  %s1675_s14 = inlined_call_operand.vmem [shape: f32[128,64], index: 14, kind: input, shape index: {}]   ;;  %s1676_s15 = inlined_call_operand.vmem [shape: f32[1,64], index: 15, kind: input, shape index: {}]   ;;  %s1677_s16 = inlined_call_operand.vmem [shape: f32[64,32], index: 16, kind: input, shape index: {}]   ;;  %s1678_s17 = inlined_call_operand.vmem [shape: f32[1,32], index: 17, kind: input, shape index: {}]   ;;  %s1679_s18 = inlined_call_operand.vmem [shape: f32[32,1], index: 18, kind: input, shape index: {}]   ;;  %s1680_s19 = inlined_call_operand.<no memory space> [shape: f32[1,1], index: 19, kind: input, shape index: {}]   ;;  %s1681_s20 = inlined_call_operand.vmem [shape: f32[2,1], index: 20, kind: output, shape index: {}]  }
   0x1   :  { %1683 = sst [smem:[#allocation14_spill]] %s1661_s0  ;;  %v25_v0 = vstv %s1680_s19 }
   0x2   :  { %1684 = sst [smem:[#allocation15_spill]] %s1662_s1  ;;  %26 = vst [vmem:[#allocation2] sm:$0x1] %v25_v0 }
   0x3   :  { %1685 = sst [smem:[#allocation16_spill]] %s1663_s2 }
   0x4   :  { %1686 = sst [smem:[#allocation17_spill]] %s1664_s3 }
   0x5   :  { %1687 = sst [smem:[#allocation18_spill]] %s1665_s4 }
   0x6   :  { %1688 = sst [smem:[#allocation19_spill]] %s1681_s20 }
   0x7   :  { %27 = vsyncpa [#allocation4], 0 }
   0x8   :  { %28 = vsyncpa [#allocation6], 0  ;;  %s1689_s2 = sld [smem:[#allocation18_spill]] }
   0xe   :  { %s54_s25 = sshll.u32 %s1689_s2, 4  ;;  %s55_s25 = int_to_ptr.hbm [resolvable:$true] %s54_s25 }
   0xf   :  { %29 = vsyncpa [#allocation9], 0  ;;  %s1230_s3 = smov [#allocation5]   ;;  %s85_s4 = sshll.u32 %s1671_s10, 4  ;;  %s86_s4 = int_to_ptr.hbm [resolvable:$true] %s85_s4 }
  0x10   :  { %s56_s26 = sshll.u32 %s1230_s3, 4  ;;  %s1231_s29 = smov [#allocation8]   ;;  %s57_s26 = int_to_ptr.vmem [resolvable:$true] %s56_s26 }
  0x11   :  { %59 = dma.hbm_to_vmem [thread:$0]  %s55_s25, 64, %s57_s26, [#allocation6]  }
  0x12   :  { %s87_s19 = sshll.u32 %s1231_s29, 4  ;;  %s1232_s30 = smov 256   ;;  %s88_s19 = int_to_ptr.vmem [resolvable:$true] %s87_s19 }
  0x13   :  { %s1233_s0 = smov 16   ;;  %s1690_s22 = sld [smem:[#allocation15_spill]] }
  0x14   :  { %93 = dma.hbm_to_vmem [thread:$0]  %s86_s4, 8192, %s88_s19, [#allocation9], %s1232_s30, %s1232_s30, %s1233_s0  }
  0x15   :  { %s1234_s24 = smov [#allocation3]   ;;  %s70_s10 = sshll.u32 %s1669_s8, 4  ;;  %s71_s10 = int_to_ptr.hbm [resolvable:$true] %s70_s10 }
  0x16   :  { %s38_s2 = sshll.u32 %s1234_s24, 4  ;;  %s1235_s25 = smov 128   ;;  %s39_s2 = int_to_ptr.vmem [resolvable:$true] %s38_s2 }
  0x17   :  { %s1236_s26 = smov 8   ;;  %s1237_s27 = smov [#allocation7]  }
  0x18   :  { %s72_s28 = sshll.u32 %s1237_s27, 4  ;;  %s100_s19 = sshll.u32 %s1673_s12, 4  ;;  %s73_s28 = int_to_ptr.vmem [resolvable:$true] %s72_s28  ;;  %s101_s19 = int_to_ptr.hbm [resolvable:$true] %s100_s19 }
  0x19   :  { %s36_s23 = sshll.u32 %s1690_s22, 4  ;;  %s1238_s30 = smov [#allocation10]   ;;  %s37_s23 = int_to_ptr.hbm [resolvable:$true] %s36_s23 }
  0x1a   :  { %44 = dma.hbm_to_vmem [thread:$0]  %s37_s23, 512, %s39_s2, [#allocation4], %s1235_s25, %s1235_s25, %s1236_s26  }
  0x1b   :  { %78 = dma.hbm_to_vmem [thread:$0]  %s71_s10, 4096, %s73_s28, [#allocation6], %s1235_s25, %s1235_s25, %s1236_s26  }
  0x1c   :  { %s102_s0 = sshll.u32 %s1238_s30, 4  ;;  %s103_s0 = int_to_ptr.vmem [resolvable:$true] %s102_s0 }
  0x1d   :  { %108 = dma.hbm_to_vmem [thread:$0]  %s101_s19, 4096, %s103_s0, [#allocation9], %s1235_s25, %s1235_s25, %s1236_s26  }
  0x1e   :  { %1224 = dma.done.wait [#allocation4], 512  }
  0x1f   :  { %1225 = vsyncadd [#allocation4], 4294966784 }
  0x20   :  { %1226 = dma.done.wait [#allocation6], 4160  }
  0x21   :  { %1227 = vsyncadd [#allocation6], 4294963136 }
  0x22   :  { %1228 = dma.done.wait [#allocation9], 12288  }
  0x23   :  { %1229 = vsyncadd [#allocation9], 4294955008  ;;  %s1691_s21 = sld [smem:[#allocation14_spill]]  ;;  %vm208_vm0 = vcmask 1043456   ;;  %vm195_vm1 = vcmask 31744   ;;  %v1379_v6 = vld [vmem:[#allocation3] sm:$0xff] }
  0x24   :  { %s1692_s25 = sld [smem:[#allocation17_spill]]  ;;  %vm151_vm2 = vcmask 261120   ;;  %v1384_v7 = vld [vmem:[#allocation3 + $0x8] sm:$0xff]  ;;  %v1389_v8 = vld [vmem:[#allocation3 + $0x10] sm:$0xff]  ;;  %v1394_v9 = vld [vmem:[#allocation3 + $0x18] sm:$0xff] }
  0x25   :  { %v194_v10 = vld [vmem:[#allocation5] sm:$0xf]  ;;  %v349_v11 = vld [vmem:[%s1667_s6 + $0x78] sm:$0xff]  ;;  %v348_v12 = vld [vmem:[%s1667_s6 + $0x70] sm:$0xff]  ;;  %s1693_s8 = sld [smem:[#allocation16_spill]] }
  0x26   :  { %1058 = vmatpush.msk.msra.mxu1 %vm208_vm0, %v194_v10  ;;  %v347_v13 = vld [vmem:[%s1667_s6 + $0x68] sm:$0xff]  ;;  %v346_v14 = vld [vmem:[%s1667_s6 + $0x60] sm:$0xff]  ;;  %v345_v15 = vld [vmem:[%s1667_s6 + $0x58] sm:$0xff]  ;;  %s1694_s2 = sld [smem:[#allocation19_spill]] }
  0x27   :  { %v344_v17 = vld [vmem:[%s1667_s6 + $0x50] sm:$0xff]  ;;  %v343_v18 = vld [vmem:[%s1667_s6 + $0x48] sm:$0xff]  ;;  %v342_v19 = vld [vmem:[%s1667_s6 + $0x40] sm:$0xff] }
  0x28   :  { %370 = vmatpush.msrb.mxu1 %v349_v11  ;;  %v341_v20 = vld [vmem:[%s1667_s6 + $0x38] sm:$0xff]  ;;  %v340_v22 = vld [vmem:[%s1667_s6 + $0x30] sm:$0xff]  ;;  %v339_v23 = vld [vmem:[%s1667_s6 + $0x28] sm:$0xff] }
  0x29   :  { %v150_v1 = vld [vmem:[%s1691_s21 + $0x18] sm:$0xff]  ;;  %v149_v2 = vld [vmem:[%s1691_s21 + $0x10] sm:$0xff]  ;;  %v148_v3 = vld [vmem:[%s1691_s21 + $0x8] sm:$0xff] }
  0x2a   :  { %176 = vmatpush.msra.mxu0 %v150_v1  ;;  %v147_v4 = vld [vmem:[%s1691_s21] sm:$0xff]  ;;  %371 = vmatpush.msrb.mxu1 %v348_v12  ;;  %v337_v27 = vld [vmem:[%s1667_s6 + $0x18] sm:$0xff]  ;;  %v336_v28 = vld [vmem:[%s1667_s6 + $0x10] sm:$0xff] }
  0x2b   :  { %v193_v5 = vld [vmem:[%s1692_s25] sm:$0xf]  ;;  %v335_v29 = vld [vmem:[%s1667_s6 + $0x8] sm:$0xff]  ;;  %v365_v56 = vld [vmem:[%s1667_s6 + $0xf8] sm:$0xff] }
  0x2c   :  { %177 = vmatpush.msra.mxu0 %v149_v2  ;;  %1063 = vmatpush.msk.msra.mxu2 %vm208_vm0, %v193_v5  ;;  %v338_v24 = vld [vmem:[%s1667_s6 + $0x20] sm:$0xff]  ;;  %v364_v57 = vld [vmem:[%s1667_s6 + $0xf0] sm:$0xff]  ;;  %v363_v58 = vld [vmem:[%s1667_s6 + $0xe8] sm:$0xff] }
  0x2d   :  { %1064 = vmatmul.msk.f32.vlgmr.msra.gmra.mxu2 %vm195_vm1, %v147_v4  ;;  %372 = vmatpush.msrb.mxu1 %v347_v13  ;;  %v334_v30 = vld [vmem:[%s1667_s6] sm:$0xff]  ;;  %v361_v60 = vld [vmem:[%s1667_s6 + $0xd8] sm:$0xff]  ;;  %v360_v61 = vld [vmem:[%s1667_s6 + $0xd0] sm:$0xff] }
  0x2e   :  { %178 = vmatpush.msra.mxu0 %v148_v3  ;;  %v1093_v32 = vld [vmem:[%s1666_s5] ss:$0 sm:$0xff]  ;;  %399 = vmatpush.msrb.mxu2 %v365_v56  ;;  %v359_v62 = vld [vmem:[%s1667_s6 + $0xc8] sm:$0xff]  ;;  %v357_v0 = vld [vmem:[%s1667_s6 + $0xb8] sm:$0xff] }
  0x2f   :  { %373 = vmatpush.msrb.mxu1 %v346_v14  ;;  %v362_v59 = vld [vmem:[%s1667_s6 + $0xe0] sm:$0xff]  ;;  %v352_v5 = vld [vmem:[%s1667_s6 + $0x90] sm:$0xff]  ;;  %v351_v10 = vld [vmem:[%s1667_s6 + $0x88] sm:$0xff] }
  0x30   :  { %179 = vmatpush.msra.mxu0 %v147_v4  ;;  %400 = vmatpush.msrb.mxu2 %v364_v57  ;;  %v358_v63 = vld [vmem:[%s1667_s6 + $0xc0] sm:$0xff]  ;;  %v353_v4 = vld [vmem:[%s1667_s6 + $0x98] sm:$0xff]  ;;  %v482_v14 = vld [vmem:[#allocation7 + $0x68] sm:$0xff] }
  0x31   :  { %1054 = vmatmul.msk.f32.vlgmr.msra.gmra.mxu0 %vm151_vm2, %v1379_v6  ;;  %374 = vmatpush.msrb.mxu1 %v345_v15  ;;  %v350_v11 = vld [vmem:[%s1667_s6 + $0x80] sm:$0xff]  ;;  %v483_v13 = vld [vmem:[#allocation7 + $0x70] sm:$0xff] }
  0x32   :  { %401 = vmatpush.msrb.mxu2 %v363_v58  ;;  %v484_v12 = vld [vmem:[#allocation7 + $0x78] sm:$0xff]  ;;  %v481_v15 = vld [vmem:[#allocation7 + $0x60] sm:$0xff]  ;;  %v499_v58 = vld [vmem:[#allocation7 + $0xf0] sm:$0xff] }
  0x33   :  { %375 = vmatpush.msrb.mxu1 %v344_v17  ;;  %v500_v57 = vld [vmem:[#allocation7 + $0xf8] sm:$0xff] }
  0x34   :  { %402 = vmatpush.msrb.mxu2 %v362_v59  ;;  %v498_v59 = vld [vmem:[#allocation7 + $0xe8] sm:$0xff] }
  0x35   :  { %1065 = vmatmul.msk.f32.gmra.mxu2 %vm195_vm1, %v148_v3  ;;  %376 = vmatpush.msrb.mxu1 %v343_v18  ;;  %v354_v3 = vld [vmem:[%s1667_s6 + $0xa0] sm:$0xff]  ;;  %v479_v18 = vld [vmem:[#allocation7 + $0x50] sm:$0xff] }
  0x36   :  { %403 = vmatpush.msrb.mxu2 %v361_v60  ;;  %v497_v60 = vld [vmem:[#allocation7 + $0xe0] sm:$0xff] }
  0x37   :  { %377 = vmatpush.msrb.mxu1 %v342_v19  ;;  %v478_v19 = vld [vmem:[#allocation7 + $0x48] sm:$0xff] }
  0x38   :  { %404 = vmatpush.msrb.mxu2 %v360_v61  ;;  %v496_v61 = vld [vmem:[#allocation7 + $0xd8] sm:$0xff] }
  0x39   :  { %1055 = vmatmul.msk.f32.gmra.mxu0 %vm151_vm2, %v1384_v7  ;;  %378 = vmatpush.msrb.mxu1 %v341_v20  ;;  %v477_v20 = vld [vmem:[#allocation7 + $0x40] sm:$0xff] }
  0x3a   :  { %405 = vmatpush.msrb.mxu2 %v359_v62  ;;  %v495_v62 = vld [vmem:[#allocation7 + $0xd0] sm:$0xff] }
  0x3b   :  { %379 = vmatpush.msrb.mxu1 %v340_v22 }
  0x3c   :  { %406 = vmatpush.msrb.mxu2 %v358_v63  ;;  %v494_v63 = vld [vmem:[#allocation7 + $0xc8] sm:$0xff] }
  0x3d   :  { %1066 = vmatmul.msk.f32.gmra.mxu2 %vm195_vm1, %v149_v2  ;;  %380 = vmatpush.msrb.mxu1 %v339_v23  ;;  %v355_v2 = vld [vmem:[%s1667_s6 + $0xa8] sm:$0xff]  ;;  %v475_v23 = vld [vmem:[#allocation7 + $0x30] sm:$0xff] }
  0x3e   :  { %407 = vmatpush.msrb.mxu2 %v357_v0  ;;  %v493_v0 = vld [vmem:[#allocation7 + $0xc0] sm:$0xff] }
  0x3f   :  { %381 = vmatpush.msrb.mxu1 %v338_v24  ;;  %v474_v24 = vld [vmem:[#allocation7 + $0x28] sm:$0xff] }
  0x41   :  { %1056 = vmatmul.msk.f32.gmra.mxu0 %vm151_vm2, %v1389_v8  ;;  %382 = vmatpush.msrb.mxu1 %v337_v27 }
  0x43   :  { %383 = vmatpush.msrb.mxu1 %v336_v28 }
  0x45   :  { %1067 = vmatmul.msk.f32.gmra.mxu2 %vm195_vm1, %v150_v1  ;;  %384 = vmatpush.msrb.mxu1 %v335_v29  ;;  %v356_v1 = vld [vmem:[%s1667_s6 + $0xb0] sm:$0xff] }
  0x46   :  { %408 = vmatpush.msrb.mxu2 %v356_v1  ;;  %v471_v29 = vld [vmem:[#allocation7 + $0x10] sm:$0xff]  ;;  %v492_v1 = vld [vmem:[#allocation7 + $0xb8] sm:$0xff] }
  0x47   :  { %385 = vmatpush.msrb.mxu1 %v334_v30  ;;  %v470_v30 = vld [vmem:[#allocation7 + $0x8] sm:$0xff] }
  0x48   :  { %409 = vmatpush.msrb.mxu2 %v355_v2  ;;  %v491_v2 = vld [vmem:[#allocation7 + $0xb0] sm:$0xff] }
  0x49   :  { %1057 = vmatmul.msk.f32.gmra.mxu0 %vm151_vm2, %v1394_v9 }
  0x4a   :  { %410 = vmatpush.msrb.mxu2 %v354_v3  ;;  %v490_v3 = vld [vmem:[#allocation7 + $0xa8] sm:$0xff] }
  0x4c   :  { %411 = vmatpush.msrb.mxu2 %v353_v4  ;;  %v489_v4 = vld [vmem:[#allocation7 + $0xa0] sm:$0xff] }
  0x4e   :  { %412 = vmatpush.msrb.mxu2 %v352_v5  ;;  %v488_v5 = vld [vmem:[#allocation7 + $0x98] sm:$0xff] }
  0x50   :  { %413 = vmatpush.msrb.mxu2 %v351_v10  ;;  %v487_v10 = vld [vmem:[#allocation7 + $0x90] sm:$0xff] }
  0x52   :  { %414 = vmatpush.msrb.mxu2 %v350_v11  ;;  %v486_v11 = vld [vmem:[#allocation7 + $0x88] sm:$0xff] }
  0xae   :  { %v181_v16 = vpop.f32.mrf.mxu0 }
  0xaf   :  { %1059 = vmatmul.msk.f32.vlgmr.msra.gmra.mxu1 %vm195_vm1, %v181_v16  ;;  %v480_v16 = vld [vmem:[#allocation7 + $0x58] sm:$0xff] }
  0xb0   :  { %v273_v31 = vpop.f32.mrf.mxu2  ;;  %534 = vmatpush.msra.mxu1 %v500_v57 }
  0xb2   :  { %535 = vmatpush.msra.mxu1 %v499_v58 }
  0xb4   :  { %536 = vmatpush.msra.mxu1 %v498_v59 }
  0xb6   :  { %v184_v21 = vpop.f32.mrf.mxu0  ;;  %537 = vmatpush.msra.mxu1 %v497_v60 }
  0xb7   :  { %1060 = vmatmul.msk.f32.gmra.mxu1 %vm195_vm1, %v184_v21  ;;  %v476_v21 = vld [vmem:[#allocation7 + $0x38] sm:$0xff] }
  0xb8   :  { %v276_v35 = vpop.f32.mrf.mxu2  ;;  %538 = vmatpush.msra.mxu1 %v496_v61 }
  0xba   :  { %539 = vmatpush.msra.mxu1 %v495_v62 }
  0xbc   :  { %540 = vmatpush.msra.mxu1 %v494_v63 }
  0xbe   :  { %v187_v25 = vpop.f32.mrf.mxu0  ;;  %541 = vmatpush.msra.mxu1 %v493_v0 }
  0xbf   :  { %1061 = vmatmul.msk.f32.gmra.mxu1 %vm195_vm1, %v187_v25  ;;  %v473_v25 = vld [vmem:[#allocation7 + $0x20] sm:$0xff] }
  0xc0   :  { %v279_v42 = vpop.f32.mrf.mxu2  ;;  %542 = vmatpush.msra.mxu1 %v492_v1 }
  0xc2   :  { %543 = vmatpush.msra.mxu1 %v491_v2 }
  0xc4   :  { %544 = vmatpush.msra.mxu1 %v490_v3 }
  0xc6   :  { %v190_v26 = vpop.f32.mrf.mxu0  ;;  %545 = vmatpush.msra.mxu1 %v489_v4 }
  0xc7   :  { %1062 = vmatmul.msk.f32.gmra.mxu1 %vm195_vm1, %v190_v26  ;;  %v472_v26 = vld [vmem:[#allocation7 + $0x18] sm:$0xff]  ;;  %vm970_vm1 = vcmask 523264  }
  0xc8   :  { %v282_v49 = vpop.f32.mrf.mxu2  ;;  %546 = vmatpush.msra.mxu1 %v488_v5 }
  0xca   :  { %547 = vmatpush.msra.mxu1 %v487_v10 }
  0xcc   :  { %548 = vmatpush.msra.mxu1 %v486_v11 }
 0x12c   :  { %v229_v33 = vpop.f32.mrf.mxu1 }
 0x12d   :  { %v274_v34 = vadd.f32 %v273_v31, %v229_v33  ;;  %v469_v31 = vld [vmem:[#allocation7] sm:$0xff]  ;;  %v1094_v33 = vld [vmem:[%s1668_s7] ss:$0 sm:$0xff] }
 0x12f   :  { %v289_v36 = vadd.f32 %v1093_v32, %v274_v34 }
 0x131   :  { %vm293_vm3 = vcmp.gt.f32.partialorder %v289_v36, 0.0  ;;  %v297_v37 = vmul.f32 0.01, %v289_v36 }
 0x133   :  { %v301_v38 = vsel %vm293_vm3, %v289_v36, %v297_v37 }
 0x134   :  { %v232_v39 = vpop.f32.mrf.mxu1  ;;  %386 = vmatmul.f32.vlgmr.msrb.gmra.mxu1 %v301_v38 }
 0x135   :  { %v277_v40 = vadd.f32 %v276_v35, %v232_v39 }
 0x137   :  { %v290_v41 = vadd.f32 %v1093_v32, %v277_v40 }
 0x139   :  { %vm294_vm4 = vcmp.gt.f32.partialorder %v290_v41, 0.0  ;;  %v298_v43 = vmul.f32 0.01, %v290_v41 }
 0x13b   :  { %v302_v44 = vsel %vm294_vm4, %v290_v41, %v298_v43 }
 0x13c   :  { %v235_v45 = vpop.f32.mrf.mxu1  ;;  %389 = vmatmul.f32.gmra.mxu1 %v302_v44 }
 0x13d   :  { %v280_v46 = vadd.f32 %v279_v42, %v235_v45 }
 0x13f   :  { %v291_v47 = vadd.f32 %v1093_v32, %v280_v46 }
 0x141   :  { %vm295_vm5 = vcmp.gt.f32.partialorder %v291_v47, 0.0  ;;  %v299_v48 = vmul.f32 0.01, %v291_v47 }
 0x143   :  { %v303_v50 = vsel %vm295_vm5, %v291_v47, %v299_v48 }
 0x144   :  { %v238_v51 = vpop.f32.mrf.mxu1  ;;  %392 = vmatmul.f32.gmra.mxu1 %v303_v50 }
 0x145   :  { %v283_v52 = vadd.f32 %v282_v49, %v238_v51 }
 0x147   :  { %v292_v53 = vadd.f32 %v1093_v32, %v283_v52 }
 0x149   :  { %vm296_vm6 = vcmp.gt.f32.partialorder %v292_v53, 0.0  ;;  %v300_v54 = vmul.f32 0.01, %v292_v53 }
 0x14b   :  { %v304_v55 = vsel %vm296_vm6, %v292_v53, %v300_v54 }
 0x14c   :  { %317 = vmatpush.msra.mxu3 %v304_v55  ;;  %395 = vmatmul.f32.gmra.mxu1 %v304_v55 }
 0x14e   :  { %318 = vmatpush.msra.mxu3 %v303_v50 }
 0x150   :  { %319 = vmatpush.msra.mxu3 %v302_v44 }
 0x152   :  { %320 = vmatpush.msra.mxu3 %v301_v38 }
 0x153   :  { %1068 = vmatmul.msk.f32.vlgmr.msra.gmra.mxu3 %vm151_vm2, %v1379_v6 }
 0x154   :  { %505 = vmatpush.msrb.mxu3 %v484_v12  ;;  %v485_v12 = vld [vmem:[#allocation7 + $0x80] sm:$0xff] }
 0x155   :  { %549 = vmatpush.msra.mxu1 %v485_v12 }
 0x156   :  { %506 = vmatpush.msrb.mxu3 %v483_v13  ;;  %v634_v13 = vld [vmem:[#allocation8 + $0xf0] sm:$0xff] }
 0x158   :  { %507 = vmatpush.msrb.mxu3 %v482_v14  ;;  %v635_v14 = vld [vmem:[#allocation8 + $0xf8] sm:$0xff] }
 0x159   :  { %732 = vmatpush.msrb.mxu1 %v635_v14  ;;  %v666_v14 = vld [vmem:[#allocation8 + $0x1f0] sm:$0xff] }
 0x15a   :  { %508 = vmatpush.msrb.mxu3 %v481_v15  ;;  %v632_v15 = vld [vmem:[#allocation8 + $0xe0] sm:$0xff] }
 0x15b   :  { %1069 = vmatmul.msk.f32.gmra.mxu3 %vm151_vm2, %v1384_v7 }
 0x15c   :  { %509 = vmatpush.msrb.mxu3 %v480_v16  ;;  %v633_v16 = vld [vmem:[#allocation8 + $0xe8] sm:$0xff] }
 0x15d   :  { %733 = vmatpush.msrb.mxu1 %v633_v16  ;;  %v664_v16 = vld [vmem:[#allocation8 + $0x1e0] sm:$0xff] }
 0x15e   :  { %510 = vmatpush.msrb.mxu3 %v479_v18  ;;  %v631_v18 = vld [vmem:[#allocation8 + $0xd8] sm:$0xff] }
 0x15f   :  { %734 = vmatpush.msrb.mxu1 %v631_v18  ;;  %v662_v18 = vld [vmem:[#allocation8 + $0x1d0] sm:$0xff] }
 0x160   :  { %511 = vmatpush.msrb.mxu3 %v478_v19  ;;  %v628_v19 = vld [vmem:[#allocation8 + $0xc0] sm:$0xff] }
 0x162   :  { %512 = vmatpush.msrb.mxu3 %v477_v20  ;;  %v629_v20 = vld [vmem:[#allocation8 + $0xc8] sm:$0xff] }
 0x163   :  { %1070 = vmatmul.msk.f32.gmra.mxu3 %vm151_vm2, %v1389_v8  ;;  %735 = vmatpush.msrb.mxu1 %v629_v20  ;;  %v661_v20 = vld [vmem:[#allocation8 + $0x1c8] sm:$0xff] }
 0x164   :  { %513 = vmatpush.msrb.mxu3 %v476_v21  ;;  %v626_v21 = vld [vmem:[#allocation8 + $0xb0] sm:$0xff] }
 0x166   :  { %514 = vmatpush.msrb.mxu3 %v475_v23 }
 0x168   :  { %515 = vmatpush.msrb.mxu3 %v474_v24  ;;  %v624_v24 = vld [vmem:[#allocation8 + $0xa0] sm:$0xff] }
 0x16a   :  { %516 = vmatpush.msrb.mxu3 %v473_v25  ;;  %v625_v25 = vld [vmem:[#allocation8 + $0xa8] sm:$0xff] }
 0x16b   :  { %1071 = vmatmul.msk.f32.gmra.mxu3 %vm151_vm2, %v1394_v9 }
 0x16c   :  { %517 = vmatpush.msrb.mxu3 %v472_v26  ;;  %v622_v26 = vld [vmem:[#allocation8 + $0x90] sm:$0xff] }
 0x16e   :  { %518 = vmatpush.msrb.mxu3 %v471_v29  ;;  %v621_v29 = vld [vmem:[#allocation8 + $0x88] sm:$0xff] }
 0x170   :  { %519 = vmatpush.msrb.mxu3 %v470_v30  ;;  %v618_v30 = vld [vmem:[#allocation8 + $0x70] sm:$0xff] }
 0x172   :  { %520 = vmatpush.msrb.mxu3 %v469_v31  ;;  %v619_v31 = vld [vmem:[#allocation8 + $0x78] sm:$0xff] }
 0x174   :  { %703 = vmatpush.msra.mxu3 %v666_v14  ;;  %v863_v14 = vld [vmem:[#allocation10 + $0xb8] sm:$0xff] }
 0x176   :  { %704 = vmatpush.msra.mxu3 %v664_v16  ;;  %v668_v16 = vld [vmem:[%s1672_s11] sm:$0x3] }
 0x178   :  { %705 = vmatpush.msra.mxu3 %v662_v18  ;;  %v846_v18 = vld [vmem:[#allocation10 + $0x30] sm:$0xff] }
 0x1b1   :  { %v387_v32 = vpop.f32.mrf.mxu1 }
 0x1b2   :  { %v388_v34 = vadd.f32 %v1094_v33, %v387_v32 }
 0x1b9   :  { %v390_v35 = vpop.f32.mrf.mxu1 }
 0x1ba   :  { %v391_v40 = vadd.f32 %v1094_v33, %v390_v35  ;;  %v614_v35 = vld [vmem:[#allocation8 + $0x50] sm:$0xff] }
 0x1c1   :  { %v393_v43 = vpop.f32.mrf.mxu1 }
 0x1c2   :  { %v394_v46 = vadd.f32 %v1094_v33, %v393_v43  ;;  %v608_v43 = vld [vmem:[#allocation8 + $0x20] sm:$0xff] }
 0x1c9   :  { %v396_v50 = vpop.f32.mrf.mxu1 }
 0x1ca   :  { %v397_v52 = vadd.f32 %v1094_v33, %v396_v50  ;;  %v616_v33 = vld [vmem:[#allocation8 + $0x60] sm:$0xff]  ;;  %v1095_v50 = vld [vmem:[%s1670_s9] ss:$0 sm:$0xff] }
 0x1d6   :  { %v322_v17 = vpop.f32.mrf.mxu3 }
 0x1d7   :  { %415 = vmatmul.f32.vlgmr.msrb.gmra.mxu2 %v322_v17  ;;  %v630_v17 = vld [vmem:[#allocation8 + $0xd0] sm:$0xff] }
 0x1de   :  { %v325_v22 = vpop.f32.mrf.mxu3 }
 0x1df   :  { %418 = vmatmul.f32.gmra.mxu2 %v325_v22  ;;  %v627_v22 = vld [vmem:[#allocation8 + $0xb8] sm:$0xff] }
 0x1e0   :  { %736 = vmatpush.msrb.mxu1 %v627_v22  ;;  %v654_v22 = vld [vmem:[#allocation8 + $0x190] sm:$0xff] }
 0x1e2   :  { %737 = vmatpush.msrb.mxu1 %v625_v25  ;;  %v653_v25 = vld [vmem:[#allocation8 + $0x188] sm:$0xff] }
 0x1e6   :  { %v328_v27 = vpop.f32.mrf.mxu3 }
 0x1e7   :  { %421 = vmatmul.f32.gmra.mxu2 %v328_v27  ;;  %v623_v27 = vld [vmem:[#allocation8 + $0x98] sm:$0xff] }
 0x1e8   :  { %738 = vmatpush.msrb.mxu1 %v623_v27  ;;  %v651_v27 = vld [vmem:[#allocation8 + $0x178] sm:$0xff] }
 0x1ea   :  { %739 = vmatpush.msrb.mxu1 %v621_v29  ;;  %v649_v29 = vld [vmem:[#allocation8 + $0x168] sm:$0xff] }
 0x1ec   :  { %740 = vmatpush.msrb.mxu1 %v619_v31  ;;  %v647_v31 = vld [vmem:[#allocation8 + $0x158] sm:$0xff] }
 0x1ee   :  { %v331_v28 = vpop.f32.mrf.mxu3 }
 0x1ef   :  { %424 = vmatmul.f32.gmra.mxu2 %v331_v28  ;;  %v620_v28 = vld [vmem:[#allocation8 + $0x80] sm:$0xff] }
 0x25a   :  { %v416_v36 = vpop.f32.mrf.mxu2 }
 0x25b   :  { %v417_v37 = vadd.f32 %v416_v36, %v388_v34  ;;  %v617_v34 = vld [vmem:[#allocation8 + $0x68] sm:$0xff]  ;;  %v615_v36 = vld [vmem:[#allocation8 + $0x58] sm:$0xff] }
 0x25c   :  { %741 = vmatpush.msrb.mxu1 %v617_v34  ;;  %v642_v34 = vld [vmem:[#allocation8 + $0x130] sm:$0xff] }
 0x25d   :  { %v432_v38 = vmul.f32 0.01, %v417_v37  ;;  %vm428_vm7 = vcmp.gt.f32.partialorder %v417_v37, 0.0 }
 0x25e   :  { %742 = vmatpush.msrb.mxu1 %v615_v36  ;;  %v640_v36 = vld [vmem:[#allocation8 + $0x120] sm:$0xff] }
 0x25f   :  { %v436_v39 = vsel %vm428_vm7, %v417_v37, %v432_v38  ;;  %v612_v37 = vld [vmem:[#allocation8 + $0x40] sm:$0xff]  ;;  %v613_v38 = vld [vmem:[#allocation8 + $0x48] sm:$0xff] }
 0x260   :  { %521 = vmatmul.f32.vlgmr.msrb.gmra.mxu3 %v436_v39  ;;  %743 = vmatpush.msrb.mxu1 %v613_v38  ;;  %v638_v38 = vld [vmem:[#allocation8 + $0x110] sm:$0xff] }
 0x262   :  { %v419_v41 = vpop.f32.mrf.mxu2 }
 0x263   :  { %v420_v42 = vadd.f32 %v419_v41, %v391_v40  ;;  %v611_v40 = vld [vmem:[#allocation8 + $0x38] sm:$0xff] }
 0x264   :  { %744 = vmatpush.msrb.mxu1 %v611_v40  ;;  %v636_v40 = vld [vmem:[#allocation8 + $0x100] sm:$0xff] }
 0x265   :  { %vm429_vm8 = vcmp.gt.f32.partialorder %v420_v42, 0.0  ;;  %v433_v44 = vmul.f32 0.01, %v420_v42 }
 0x267   :  { %v437_v45 = vsel %vm429_vm8, %v420_v42, %v433_v44  ;;  %v609_v44 = vld [vmem:[#allocation8 + $0x28] sm:$0xff] }
 0x268   :  { %524 = vmatmul.f32.gmra.mxu3 %v437_v45  ;;  %745 = vmatpush.msrb.mxu1 %v609_v44 }
 0x26a   :  { %v422_v47 = vpop.f32.mrf.mxu2 }
 0x26b   :  { %v423_v48 = vadd.f32 %v422_v47, %v394_v46  ;;  %v607_v46 = vld [vmem:[#allocation8 + $0x18] sm:$0xff]  ;;  %v604_v47 = vld [vmem:[#allocation8] sm:$0xff] }
 0x26c   :  { %746 = vmatpush.msrb.mxu1 %v607_v46 }
 0x26d   :  { %vm430_vm9 = vcmp.gt.f32.partialorder %v423_v48, 0.0  ;;  %v434_v49 = vmul.f32 0.01, %v423_v48 }
 0x26f   :  { %v438_v51 = vsel %vm430_vm9, %v423_v48, %v434_v49  ;;  %v605_v48 = vld [vmem:[#allocation8 + $0x8] sm:$0xff] }
 0x270   :  { %527 = vmatmul.f32.gmra.mxu3 %v438_v51  ;;  %747 = vmatpush.msrb.mxu1 %v605_v48 }
 0x272   :  { %v425_v53 = vpop.f32.mrf.mxu2 }
 0x273   :  { %v426_v54 = vadd.f32 %v425_v53, %v397_v52 }
 0x275   :  { %vm431_vm10 = vcmp.gt.f32.partialorder %v426_v54, 0.0  ;;  %v435_v55 = vmul.f32 0.01, %v426_v54 }
 0x277   :  { %v439_v56 = vsel %vm431_vm10, %v426_v54, %v435_v55 }
 0x278   :  { %452 = vmatpush.msrb.mxu0 %v439_v56  ;;  %530 = vmatmul.f32.gmra.mxu3 %v439_v56 }
 0x27a   :  { %453 = vmatpush.msrb.mxu0 %v438_v51 }
 0x27c   :  { %454 = vmatpush.msrb.mxu0 %v437_v45  ;;  %v606_v45 = vld [vmem:[#allocation8 + $0x10] sm:$0xff] }
 0x27e   :  { %455 = vmatpush.msrb.mxu0 %v436_v39  ;;  %v610_v39 = vld [vmem:[#allocation8 + $0x30] sm:$0xff] }
 0x27f   :  { %1072 = vmatmul.msk.f32.vlgmr.msrb.gmra.mxu0 %vm151_vm2, %v1379_v6 }
 0x280   :  { %674 = vmatpush.msra.mxu0 %v634_v13 }
 0x282   :  { %675 = vmatpush.msra.mxu0 %v632_v15  ;;  %v667_v15 = vld [vmem:[#allocation8 + $0x1f8] sm:$0xff] }
 0x284   :  { %676 = vmatpush.msra.mxu0 %v630_v17  ;;  %v665_v17 = vld [vmem:[#allocation8 + $0x1e8] sm:$0xff] }
 0x286   :  { %677 = vmatpush.msra.mxu0 %v628_v19  ;;  %v663_v19 = vld [vmem:[#allocation8 + $0x1d8] sm:$0xff] }
 0x287   :  { %1073 = vmatmul.msk.f32.gmra.mxu0 %vm151_vm2, %v1384_v7 }
 0x288   :  { %678 = vmatpush.msra.mxu0 %v626_v21  ;;  %v659_v21 = vld [vmem:[#allocation8 + $0x1b8] sm:$0xff] }
 0x28a   :  { %679 = vmatpush.msra.mxu0 %v624_v24  ;;  %v652_v24 = vld [vmem:[#allocation8 + $0x180] sm:$0xff] }
 0x28c   :  { %680 = vmatpush.msra.mxu0 %v622_v26  ;;  %v650_v26 = vld [vmem:[#allocation8 + $0x170] sm:$0xff] }
 0x28e   :  { %681 = vmatpush.msra.mxu0 %v620_v28  ;;  %v648_v28 = vld [vmem:[#allocation8 + $0x160] sm:$0xff] }
 0x28f   :  { %1074 = vmatmul.msk.f32.gmra.mxu0 %vm151_vm2, %v1389_v8 }
 0x290   :  { %682 = vmatpush.msra.mxu0 %v618_v30  ;;  %v646_v30 = vld [vmem:[#allocation8 + $0x150] sm:$0xff] }
 0x292   :  { %683 = vmatpush.msra.mxu0 %v616_v33  ;;  %v645_v33 = vld [vmem:[#allocation8 + $0x148] sm:$0xff] }
 0x294   :  { %684 = vmatpush.msra.mxu0 %v614_v35  ;;  %v643_v35 = vld [vmem:[#allocation8 + $0x138] sm:$0xff] }
 0x296   :  { %685 = vmatpush.msra.mxu0 %v612_v37  ;;  %v641_v37 = vld [vmem:[#allocation8 + $0x128] sm:$0xff] }
 0x297   :  { %1075 = vmatmul.msk.f32.gmra.mxu0 %vm151_vm2, %v1394_v9 }
 0x298   :  { %686 = vmatpush.msra.mxu0 %v610_v39  ;;  %v639_v39 = vld [vmem:[#allocation8 + $0x118] sm:$0xff] }
 0x29a   :  { %687 = vmatpush.msra.mxu0 %v608_v43 }
 0x29c   :  { %688 = vmatpush.msra.mxu0 %v606_v45 }
 0x29e   :  { %689 = vmatpush.msra.mxu0 %v604_v47 }
 0x2e3   :  { %v522_v49 = vpop.f32.mrf.mxu3 }
 0x2e4   :  { %v523_v51 = vadd.f32 %v1095_v50, %v522_v49 }
 0x2eb   :  { %v525_v52 = vpop.f32.mrf.mxu3 }
 0x2ec   :  { %v526_v57 = vadd.f32 %v1095_v50, %v525_v52  ;;  %v871_v52 = vld [vmem:[#allocation10 + $0xf8] sm:$0xff] }
 0x2f3   :  { %v528_v60 = vpop.f32.mrf.mxu3 }
 0x2f4   :  { %v529_v63 = vadd.f32 %v1095_v50, %v528_v60 }
 0x2fb   :  { %v531_v3 = vpop.f32.mrf.mxu3 }
 0x2fc   :  { %v457_v23 = vpop.f32.mrf.mxu0  ;;  %v532_v5 = vadd.f32 %v1095_v50, %v531_v3  ;;  %v850_v3 = vld [vmem:[#allocation10 + $0x50] sm:$0xff] }
 0x2fd   :  { %550 = vmatmul.f32.vlgmr.msra.gmra.mxu1 %v457_v23  ;;  %v655_v23 = vld [vmem:[#allocation8 + $0x198] sm:$0xff] }
 0x304   :  { %v460_v32 = vpop.f32.mrf.mxu0 }
 0x305   :  { %553 = vmatmul.f32.gmra.mxu1 %v460_v32  ;;  %v644_v32 = vld [vmem:[#allocation8 + $0x140] sm:$0xff] }
 0x30c   :  { %v463_v41 = vpop.f32.mrf.mxu0 }
 0x30d   :  { %556 = vmatmul.f32.gmra.mxu1 %v463_v41  ;;  %v637_v41 = vld [vmem:[#allocation8 + $0x108] sm:$0xff] }
 0x314   :  { %v466_v42 = vpop.f32.mrf.mxu0 }
 0x315   :  { %559 = vmatmul.f32.gmra.mxu1 %v466_v42 }
 0x37a   :  { %v551_v53 = vpop.f32.mrf.mxu1 }
 0x37b   :  { %v552_v54 = vadd.f32 %v551_v53, %v523_v51  ;;  %v870_v53 = vld [vmem:[#allocation10 + $0xf0] sm:$0xff] }
 0x37d   :  { %vm563_vm11 = vcmp.gt.f32.partialorder %v552_v54, 0.0  ;;  %v567_v55 = vmul.f32 0.01, %v552_v54 }
 0x37f   :  { %v571_v56 = vsel %vm563_vm11, %v552_v54, %v567_v55  ;;  %v855_v54 = vld [vmem:[#allocation10 + $0x78] sm:$0xff]  ;;  %v854_v55 = vld [vmem:[#allocation10 + $0x70] sm:$0xff] }
 0x380   :  { %690 = vmatmul.f32.vlgmr.msra.gmra.mxu0 %v571_v56  ;;  %748 = vmatmul.f32.vlgmr.msrb.gmra.mxu1 %v571_v56 }
 0x381   :  { %876 = vmatpush.msra.mxu1 %v855_v54  ;;  %v928_v54 = vld [vmem:[%s1675_s14 + $0x58] sm:$0xff] }
 0x382   :  { %v554_v58 = vpop.f32.mrf.mxu1 }
 0x383   :  { %v555_v59 = vadd.f32 %v554_v58, %v526_v57  ;;  %v853_v57 = vld [vmem:[#allocation10 + $0x68] sm:$0xff]  ;;  %877 = vmatpush.msra.mxu1 %v854_v55  ;;  %v868_v58 = vld [vmem:[#allocation10 + $0xe0] sm:$0xff] }
 0x384   :  { %v927_v55 = vld [vmem:[%s1675_s14 + $0x50] sm:$0xff] }
 0x385   :  { %v568_v61 = vmul.f32 0.01, %v555_v59  ;;  %vm564_vm12 = vcmp.gt.f32.partialorder %v555_v59, 0.0  ;;  %878 = vmatpush.msra.mxu1 %v853_v57  ;;  %v925_v57 = vld [vmem:[%s1675_s14 + $0x40] sm:$0xff] }
 0x387   :  { %v572_v62 = vsel %vm564_vm12, %v555_v59, %v568_v61  ;;  %v852_v59 = vld [vmem:[#allocation10 + $0x60] sm:$0xff] }
 0x388   :  { %693 = vmatmul.f32.gmra.mxu0 %v572_v62  ;;  %751 = vmatmul.f32.gmra.mxu1 %v572_v62 }
 0x389   :  { %879 = vmatpush.msra.mxu1 %v852_v59  ;;  %v923_v59 = vld [vmem:[%s1675_s14 + $0x30] sm:$0xff] }
 0x38a   :  { %v557_v0 = vpop.f32.mrf.mxu1 }
 0x38b   :  { %v558_v1 = vadd.f32 %v557_v0, %v529_v63  ;;  %v851_v63 = vld [vmem:[#allocation10 + $0x58] sm:$0xff] }
 0x38c   :  { %880 = vmatpush.msra.mxu1 %v851_v63 }
 0x38d   :  { %v569_v2 = vmul.f32 0.01, %v558_v1  ;;  %vm565_vm13 = vcmp.gt.f32.partialorder %v558_v1, 0.0 }
 0x38e   :  { %881 = vmatpush.msra.mxu1 %v850_v3 }
 0x38f   :  { %v573_v4 = vsel %vm565_vm13, %v558_v1, %v569_v2  ;;  %v866_v2 = vld [vmem:[#allocation10 + $0xd0] sm:$0xff] }
 0x390   :  { %696 = vmatmul.f32.gmra.mxu0 %v573_v4  ;;  %754 = vmatmul.f32.gmra.mxu1 %v573_v4 }
 0x392   :  { %v560_v10 = vpop.f32.mrf.mxu1 }
 0x393   :  { %v561_v11 = vadd.f32 %v560_v10, %v532_v5  ;;  %v849_v5 = vld [vmem:[#allocation10 + $0x48] sm:$0xff]  ;;  %v864_v10 = vld [vmem:[#allocation10 + $0xc0] sm:$0xff] }
 0x394   :  { %882 = vmatpush.msra.mxu1 %v849_v5  ;;  %v919_v5 = vld [vmem:[%s1675_s14 + $0x10] sm:$0xff] }
 0x395   :  { %vm566_vm14 = vcmp.gt.f32.partialorder %v561_v11, 0.0  ;;  %v570_v12 = vmul.f32 0.01, %v561_v11 }
 0x397   :  { %v574_v13 = vsel %vm566_vm14, %v561_v11, %v570_v12  ;;  %v848_v11 = vld [vmem:[#allocation10 + $0x40] sm:$0xff] }
 0x398   :  { %587 = vmatpush.msra.mxu2 %v574_v13  ;;  %699 = vmatmul.f32.gmra.mxu0 %v574_v13 }
 0x399   :  { %757 = vmatmul.f32.gmra.mxu1 %v574_v13 }
 0x39a   :  { %588 = vmatpush.msra.mxu2 %v573_v4  ;;  %v865_v4 = vld [vmem:[#allocation10 + $0xc8] sm:$0xff]  ;;  %883 = vmatpush.msra.mxu1 %v848_v11  ;;  %v917_v11 = vld [vmem:[%s1675_s14] sm:$0xff] }
 0x39c   :  { %589 = vmatpush.msra.mxu2 %v572_v62  ;;  %v867_v62 = vld [vmem:[#allocation10 + $0xd8] sm:$0xff] }
 0x39e   :  { %590 = vmatpush.msra.mxu2 %v571_v56  ;;  %v869_v56 = vld [vmem:[#allocation10 + $0xe8] sm:$0xff] }
 0x39f   :  { %1076 = vmatmul.msk.f32.vlgmr.msra.gmra.mxu2 %vm151_vm2, %v1379_v6  ;;  %v660_v6 = vld [vmem:[#allocation8 + $0x1c0] sm:$0xff] }
 0x3a0   :  { %761 = vmatpush.msrb.mxu2 %v667_v15  ;;  %706 = vmatpush.msra.mxu3 %v660_v6  ;;  %v847_v15 = vld [vmem:[#allocation10 + $0x38] sm:$0xff] }
 0x3a1   :  { %884 = vmatpush.msra.mxu1 %v847_v15  ;;  %v962_v15 = vld [vmem:[%s1677_s16 + $0x20] sm:$0xff] }
 0x3a2   :  { %762 = vmatpush.msrb.mxu2 %v665_v17  ;;  %v862_v17 = vld [vmem:[#allocation10 + $0xb0] sm:$0xff] }
 0x3a3   :  { %885 = vmatpush.msra.mxu1 %v846_v18 }
 0x3a4   :  { %763 = vmatpush.msrb.mxu2 %v663_v19 }
 0x3a6   :  { %764 = vmatpush.msrb.mxu2 %v661_v20  ;;  %v861_v20 = vld [vmem:[#allocation10 + $0xa8] sm:$0xff] }
 0x3a7   :  { %1077 = vmatmul.msk.f32.gmra.mxu2 %vm151_vm2, %v1384_v7  ;;  %v658_v7 = vld [vmem:[#allocation8 + $0x1b0] sm:$0xff] }
 0x3a8   :  { %707 = vmatpush.msra.mxu3 %v658_v7  ;;  %765 = vmatpush.msrb.mxu2 %v659_v21  ;;  %v845_v7 = vld [vmem:[#allocation10 + $0x28] sm:$0xff]  ;;  %v670_v21 = vperm.slane %v668_v16, 0 }
 0x3a9   :  { %886 = vmatpush.msra.mxu1 %v845_v7 }
 0x3af   :  { %1078 = vmatmul.msk.f32.gmra.mxu2 %vm151_vm2, %v1389_v8  ;;  %v656_v8 = vld [vmem:[#allocation8 + $0x1a0] sm:$0xff] }
 0x3b0   :  { %708 = vmatpush.msra.mxu3 %v656_v8  ;;  %v671_v8 = vperm.slane %v668_v16, 1  ;;  %v961_v16 = vld [vmem:[%s1677_s16 + $0x18] sm:$0xff] }
 0x3b2   :  { %709 = vmatpush.msra.mxu3 %v654_v22  ;;  %v844_v22 = vld [vmem:[#allocation10 + $0x20] sm:$0xff] }
 0x3b3   :  { %887 = vmatpush.msra.mxu1 %v844_v22  ;;  %v998_v22 = vld [vmem:[%s1679_s18 + $0x18] sm:$0xff] }
 0x3b4   :  { %710 = vmatpush.msra.mxu3 %v652_v24 }
 0x3b6   :  { %711 = vmatpush.msra.mxu3 %v650_v26 }
 0x3b7   :  { %1079 = vmatmul.msk.f32.gmra.mxu2 %vm151_vm2, %v1394_v9  ;;  %v657_v9 = vld [vmem:[#allocation8 + $0x1a8] sm:$0xff] }
 0x3b8   :  { %766 = vmatpush.msrb.mxu2 %v657_v9  ;;  %712 = vmatpush.msra.mxu3 %v648_v28  ;;  %v860_v9 = vld [vmem:[#allocation10 + $0xa0] sm:$0xff] }
 0x3ba   :  { %767 = vmatpush.msrb.mxu2 %v655_v23  ;;  %713 = vmatpush.msra.mxu3 %v646_v30 }
 0x3bc   :  { %768 = vmatpush.msrb.mxu2 %v653_v25  ;;  %714 = vmatpush.msra.mxu3 %v644_v32 }
 0x3be   :  { %769 = vmatpush.msrb.mxu2 %v651_v27  ;;  %715 = vmatpush.msra.mxu3 %v642_v34 }
 0x3c0   :  { %770 = vmatpush.msrb.mxu2 %v649_v29  ;;  %716 = vmatpush.msra.mxu3 %v640_v36  ;;  %v858_v36 = vld [vmem:[#allocation10 + $0x90] sm:$0xff] }
 0x3c2   :  { %771 = vmatpush.msrb.mxu2 %v647_v31  ;;  %717 = vmatpush.msra.mxu3 %v638_v38  ;;  %v859_v31 = vld [vmem:[#allocation10 + $0x98] sm:$0xff] }
 0x3c4   :  { %772 = vmatpush.msrb.mxu2 %v645_v33  ;;  %718 = vmatpush.msra.mxu3 %v636_v40 }
 0x3c6   :  { %773 = vmatpush.msrb.mxu2 %v643_v35 }
 0x3c8   :  { %774 = vmatpush.msrb.mxu2 %v641_v37 }
 0x3ca   :  { %775 = vmatpush.msrb.mxu2 %v639_v39 }
 0x3cc   :  { %776 = vmatpush.msrb.mxu2 %v637_v41 }
 0x3ce   :  { %896 = vmatpush.msra.mxu2 %v871_v52  ;;  %v930_v52 = vld [vmem:[%s1675_s14 + $0x68] sm:$0xff] }
 0x3d0   :  { %897 = vmatpush.msra.mxu2 %v870_v53  ;;  %v929_v53 = vld [vmem:[%s1675_s14 + $0x60] sm:$0xff] }
 0x3d2   :  { %898 = vmatpush.msra.mxu2 %v869_v56  ;;  %v926_v56 = vld [vmem:[%s1675_s14 + $0x48] sm:$0xff] }
 0x3d4   :  { %899 = vmatpush.msra.mxu2 %v868_v58  ;;  %v924_v58 = vld [vmem:[%s1675_s14 + $0x38] sm:$0xff] }
 0x3d6   :  { %900 = vmatpush.msra.mxu2 %v867_v62 }
 0x3d8   :  { %901 = vmatpush.msra.mxu2 %v866_v2 }
 0x3da   :  { %902 = vmatpush.msra.mxu2 %v865_v4  ;;  %v920_v4 = vld [vmem:[%s1675_s14 + $0x18] sm:$0xff] }
 0x3dc   :  { %903 = vmatpush.msra.mxu2 %v864_v10  ;;  %v918_v10 = vld [vmem:[%s1675_s14 + $0x8] sm:$0xff] }
 0x3de   :  { %904 = vmatpush.msra.mxu2 %v863_v14  ;;  %v963_v14 = vld [vmem:[%s1677_s16 + $0x28] sm:$0xff] }
 0x3e0   :  { %905 = vmatpush.msra.mxu2 %v862_v17  ;;  %v1096_v17 = vld [vmem:[%s1674_s13] ss:$0 sm:$0xff] }
 0x3e2   :  { %906 = vmatpush.msra.mxu2 %v861_v20 }
 0x3e4   :  { %907 = vmatpush.msra.mxu2 %v860_v9  ;;  %v958_v9 = vld [vmem:[%s1677_s16] sm:$0xff] }
 0x3e6   :  { %908 = vmatpush.msra.mxu2 %v859_v31 }
 0x3e8   :  { %909 = vmatpush.msra.mxu2 %v858_v36 }
 0x3fd   :  { %v1532_v46 = vpop.f32.mrf.mxu0  ;;  %v1534_v47 = vpop.f32.mrf.mxu1 }
 0x3fe   :  { %v692_v37 = vadd.f32 %v1532_v46, %v670_v21  ;;  %v750_v38 = vadd.f32 %v1534_v47, %v671_v8  ;;  %v842_v46 = vld [vmem:[#allocation10 + $0x10] sm:$0xff]  ;;  %v856_v47 = vld [vmem:[#allocation10 + $0x80] sm:$0xff] }
 0x405   :  { %v1536_v48 = vpop.f32.mrf.mxu0  ;;  %v1538_v49 = vpop.f32.mrf.mxu1 }
 0x406   :  { %v695_v32 = vadd.f32 %v1536_v48, %v670_v21  ;;  %v753_v33 = vadd.f32 %v1538_v49, %v671_v8  ;;  %v841_v48 = vld [vmem:[#allocation10 + $0x8] sm:$0xff]  ;;  %v840_v49 = vld [vmem:[#allocation10] sm:$0xff] }
 0x40d   :  { %v697_v0 = vpop.f32.mrf.mxu0  ;;  %v755_v1 = vpop.f32.mrf.mxu1 }
 0x40e   :  { %v698_v25 = vadd.f32 %v697_v0, %v670_v21  ;;  %v756_v28 = vadd.f32 %v755_v1, %v671_v8 }
 0x415   :  { %v700_v19 = vpop.f32.mrf.mxu0 }
 0x416   :  { %v758_v6 = vpop.f32.mrf.mxu1  ;;  %v701_v23 = vadd.f32 %v700_v19, %v670_v21  ;;  %v960_v21 = vld [vmem:[%s1677_s16 + $0x10] sm:$0xff] }
 0x417   :  { %v759_v24 = vadd.f32 %v758_v6, %v671_v8  ;;  %v959_v8 = vld [vmem:[%s1677_s16 + $0x8] sm:$0xff] }
 0x422   :  { %v592_v42 = vpop.f32.mrf.mxu2 }
 0x423   :  { %719 = vmatmul.f32.vlgmr.msra.gmra.mxu3 %v592_v42  ;;  %777 = vmatmul.f32.vlgmr.msrb.gmra.mxu2 %v592_v42 }
 0x42a   :  { %v595_v43 = vpop.f32.mrf.mxu2 }
 0x42b   :  { %722 = vmatmul.f32.gmra.mxu3 %v595_v43  ;;  %780 = vmatmul.f32.gmra.mxu2 %v595_v43  ;;  %v790_v43 = vld [vmem:[%s1693_s8] sm:$0x3] }
 0x432   :  { %v598_v44 = vpop.f32.mrf.mxu2 }
 0x433   :  { %725 = vmatmul.f32.gmra.mxu3 %v598_v44  ;;  %783 = vmatmul.f32.gmra.mxu2 %v598_v44  ;;  %v843_v44 = vld [vmem:[#allocation10 + $0x18] sm:$0xff] }
 0x434   :  { %888 = vmatpush.msra.mxu1 %v843_v44 }
 0x436   :  { %889 = vmatpush.msra.mxu1 %v842_v46 }
 0x438   :  { %890 = vmatpush.msra.mxu1 %v841_v48 }
 0x43a   :  { %v601_v45 = vpop.f32.mrf.mxu2  ;;  %891 = vmatpush.msra.mxu1 %v840_v49 }
 0x43b   :  { %728 = vmatmul.f32.gmra.mxu3 %v601_v45  ;;  %786 = vmatmul.f32.gmra.mxu2 %v601_v45  ;;  %v857_v45 = vld [vmem:[#allocation10 + $0x88] sm:$0xff] }
 0x43c   :  { %910 = vmatpush.msra.mxu2 %v857_v45 }
 0x43e   :  { %911 = vmatpush.msra.mxu2 %v856_v47 }
 0x4a6   :  { %v1540_v50 = vpop.f32.mrf.mxu3  ;;  %v1542_v51 = vpop.f32.mrf.mxu2 }
 0x4a7   :  { %v721_v41 = vadd.f32 %v1540_v50, %v692_v37  ;;  %v779_v42 = vadd.f32 %v1542_v51, %v750_v38  ;;  %v932_v50 = vld [vmem:[%s1675_s14 + $0x78] sm:$0xff]  ;;  %v931_v51 = vld [vmem:[%s1675_s14 + $0x70] sm:$0xff] }
 0x4ae   :  { %v1544_v60 = vpop.f32.mrf.mxu3  ;;  %v1546_v61 = vpop.f32.mrf.mxu2 }
 0x4af   :  { %v724_v39 = vadd.f32 %v1544_v60, %v695_v32  ;;  %v782_v40 = vadd.f32 %v1546_v61, %v753_v33  ;;  %v922_v60 = vld [vmem:[%s1675_s14 + $0x28] sm:$0xff]  ;;  %v921_v61 = vld [vmem:[%s1675_s14 + $0x20] sm:$0xff] }
 0x4b6   :  { %v726_v12 = vpop.f32.mrf.mxu3  ;;  %v784_v13 = vpop.f32.mrf.mxu2 }
 0x4b7   :  { %v727_v34 = vadd.f32 %v726_v12, %v698_v25  ;;  %v785_v35 = vadd.f32 %v784_v13, %v756_v28  ;;  %v965_v12 = vld [vmem:[%s1677_s16 + $0x38] sm:$0xff]  ;;  %v964_v13 = vld [vmem:[%s1677_s16 + $0x30] sm:$0xff]  ;;  %v996_v28 = vld [vmem:[%s1679_s18 + $0x8] sm:$0xff] }
 0x4be   :  { %v729_v26 = vpop.f32.mrf.mxu3  ;;  %v787_v27 = vpop.f32.mrf.mxu2 }
 0x4bf   :  { %v730_v29 = vadd.f32 %v729_v26, %v701_v23  ;;  %v788_v30 = vadd.f32 %v787_v27, %v759_v24  ;;  %v1097_v23 = vld [vmem:[%s1676_s15] ss:$0 sm:$0xff]  ;;  %v997_v27 = vld [vmem:[%s1679_s18 + $0x10] sm:$0xff] }
 0x4c1   :  { %806 = vmatpush.msrb.mxu0 %v730_v29  ;;  %826 = vmatpush.msrb.mxu3 %v788_v30  ;;  %v995_v29 = vld [vmem:[%s1679_s18] sm:$0xff] }
 0x4c2   :  { %v1098_v30 = vld [vmem:[%s1678_s17] ss:$0 sm:$0xff] }
 0x4c3   :  { %807 = vmatpush.msrb.mxu0 %v727_v34  ;;  %827 = vmatpush.msrb.mxu3 %v785_v35  ;;  %v1099_v34 = vld [vmem:[#allocation2] ss:$0 sm:$0xff] }
 0x4c5   :  { %808 = vmatpush.msrb.mxu0 %v724_v39  ;;  %828 = vmatpush.msrb.mxu3 %v782_v40 }
 0x4c7   :  { %809 = vmatpush.msrb.mxu0 %v721_v41  ;;  %829 = vmatpush.msrb.mxu3 %v779_v42 }
 0x4c8   :  { %1081 = vmatmul.msk.f32.vlgmr.msrb.gmra.mxu3 %vm151_vm2, %v790_v43  ;;  %1080 = vmatmul.msk.f32.vlgmr.msrb.gmra.mxu0 %vm151_vm2, %v790_v43 }
 0x4c9   :  { %937 = vmatpush.msra.mxu0 %v932_v50  ;;  %982 = vmatpush.msra.mxu3 %v965_v12 }
 0x4cb   :  { %938 = vmatpush.msra.mxu0 %v931_v51  ;;  %983 = vmatpush.msra.mxu3 %v964_v13 }
 0x4cd   :  { %939 = vmatpush.msra.mxu0 %v930_v52  ;;  %984 = vmatpush.msra.mxu3 %v963_v14 }
 0x4cf   :  { %940 = vmatpush.msra.mxu0 %v929_v53  ;;  %985 = vmatpush.msra.mxu3 %v962_v15 }
 0x4d1   :  { %941 = vmatpush.msra.mxu0 %v928_v54  ;;  %986 = vmatpush.msra.mxu3 %v961_v16 }
 0x4d3   :  { %942 = vmatpush.msra.mxu0 %v927_v55  ;;  %987 = vmatpush.msra.mxu3 %v960_v21 }
 0x4d5   :  { %943 = vmatpush.msra.mxu0 %v926_v56  ;;  %988 = vmatpush.msra.mxu3 %v959_v8 }
 0x4d7   :  { %944 = vmatpush.msra.mxu0 %v925_v57  ;;  %989 = vmatpush.msra.mxu3 %v958_v9 }
 0x4d9   :  { %945 = vmatpush.msra.mxu0 %v924_v58  ;;  %1018 = vmatpush.msrb.mxu3 %v998_v22 }
 0x4db   :  { %946 = vmatpush.msra.mxu0 %v923_v59  ;;  %1019 = vmatpush.msrb.mxu3 %v997_v27 }
 0x4dd   :  { %947 = vmatpush.msra.mxu0 %v922_v60  ;;  %1020 = vmatpush.msrb.mxu3 %v996_v28 }
 0x4df   :  { %948 = vmatpush.msra.mxu0 %v921_v61  ;;  %1021 = vmatpush.msrb.mxu3 %v995_v29 }
 0x4e1   :  { %949 = vmatpush.msra.mxu0 %v920_v4 }
 0x4e3   :  { %950 = vmatpush.msra.mxu0 %v919_v5 }
 0x4e5   :  { %951 = vmatpush.msra.mxu0 %v918_v10 }
 0x4e7   :  { %952 = vmatpush.msra.mxu0 %v917_v11 }
 0x545   :  { %v811_v62 = vpop.f32.mrf.mxu0 }
 0x546   :  { %vm834_vm15 = vcmp.gt.f32.partialorder %v811_v62, 0.0  ;;  %v836_v63 = vmul.f32 0.01, %v811_v62 }
 0x548   :  { %v838_v0 = vsel %vm834_vm15, %v811_v62, %v836_v63 }
 0x549   :  { %892 = vmatmul.f32.vlgmr.msra.gmra.mxu1 %v838_v0 }
 0x54b   :  { %v831_v1 = vpop.f32.mrf.mxu3 }
 0x54c   :  { %vm835_vm0 = vcmp.gt.f32.partialorder %v831_v1, 0.0  ;;  %v837_v2 = vmul.f32 0.01, %v831_v1 }
 0x54e   :  { %v839_v3 = vsel %vm835_vm0, %v831_v1, %v837_v2 }
 0x54f   :  { %912 = vmatmul.f32.vlgmr.msra.gmra.mxu2 %v839_v3 }
 0x5c6   :  { %v893_v18 = vpop.f32.mrf.mxu1 }
 0x5c7   :  { %v894_v19 = vadd.f32 %v1096_v17, %v893_v18 }
 0x5d2   :  { %v913_v6 = vpop.f32.mrf.mxu2 }
 0x5d3   :  { %v914_v20 = vadd.f32 %v913_v6, %v894_v19 }
 0x5d5   :  { %v916_v7 = vmax.f32 %v914_v20, 0.0 }
 0x5d7   :  { %953 = vmatmul.f32.vlgmr.msra.gmra.mxu0 %v916_v7 }
 0x654   :  { %v954_v24 = vpop.f32.mrf.mxu0 }
 0x655   :  { %v955_v25 = vadd.f32 %v1097_v23, %v954_v24 }
 0x657   :  { %v957_v26 = vmax.f32 %v955_v25, 0.0 }
 0x659   :  { %1082 = vmatmul.msk.f32.vlgmr.msra.gmra.mxu3 %vm970_vm1, %v957_v26 }
 0x6dc   :  { %v991_v31 = vpop.f32.mrf.mxu3 }
 0x6dd   :  { %v992_v32 = vadd.f32 %v1098_v30, %v991_v31 }
 0x6df   :  { %v994_v33 = vmax.f32 %v992_v32, 0.0 }
 0x6e1   :  { %1083 = vmatmul.msk.f32.vlgmr.msrb.gmra.mxu3 %vm151_vm2, %v994_v33  ;;  %vm1045_vm2 = vcmask 1024  }
 0x764   :  { %v1023_v35 = vpop.f32.mrf.mxu3 }
 0x765   :  { %v1024_v36 = vadd.f32 %v1099_v34, %v1023_v35 }
 0x767   :  { %v1026_v37 = vsub.f32 0.0, %v1024_v36 }
 0x769   :  { %v1027_v38 = vmul.f32 1.442695, %v1026_v37 }
 0x76b   :  { %1100 = vpow2.f32 %v1027_v38 }
 0x771   :  { %v1101_v39 = vpop.eup %1100 }
 0x772   :  { %v1029_v40 = vadd.f32 1.0, %v1101_v39 }
 0x774   :  { %1102 = vrcp.f32 %v1029_v40  ;;  %v1041_v44 = vand.u32 2147483648, %v1029_v40  ;;  %v1039_v46 = vand.u32 2147483647, %v1029_v40  ;;  %vm1035_vm4 = vweird.f32 %v1029_v40 }
 0x776   :  { %v1042_v48 = vor.u32 1.1754944e-38, %v1041_v44  ;;  %vm1040_vm6 = vcmp.eq.f32.partialorder %v1039_v46, 8.507059e+37 }
 0x77a   :  { %v1103_v41 = vpop.eup %1102 }
 0x77b   :  { %v1031_v42 = vmul.f32 %v1103_v41, %v1029_v40  ;;  %vm1036_vm3 = vweird.f32 %v1103_v41 }
 0x77c   :  { %vm1037_vm5 = vmor %vm1035_vm4, %vm1036_vm3 }
 0x77d   :  { %v1032_v43 = vsub.f32 1.0, %v1031_v42 }
 0x77f   :  { %v1033_v45 = vmul.f32 %v1103_v41, %v1032_v43 }
 0x781   :  { %v1034_v47 = vadd.f32 %v1103_v41, %v1033_v45 }
 0x783   :  { %v1038_v49 = vsel %vm1037_vm5, %v1103_v41, %v1034_v47 }
 0x784   :  { %v1043_v50 = vsel %vm1040_vm6, %v1042_v48, %v1038_v49 }
 0x785   :  { %1046 = vst.msk [vmem:[%s1694_s2] sm:$0x3] %vm1045_vm2, %v1043_v50 }
 0x786   :  { %1051 = vsyncpa [#allocation4], 1 }
 0x787   :  { %1052 = vsyncpa [#allocation6], 1 }
 0x788   :  { %1053 = vsyncpa [#allocation9], 1 }

</bundles_post_ra>
